<compile_context>
chip_gen: v7x
topology: tpu7x:2x2x1
jax: 0.10.0
libtpu: 0.0.40
codegen_flags: <defaults>
</compile_context>

<pallas_src>
import functools

import jax
import jax.numpy as jnp
from jax.experimental import pallas as pl
from jax.experimental.pallas import tpu as pltpu


def lstm_reg_kernel(x2_ref, wih_ref, whh_ref, b_ref, wreg_ref, breg_ref,
                    out_ref, gx_sc, hs_sc, *, seq_len, batch_pad):
    """Fused LSTM + Linear head; entire sequence in a single invocation.

    x2_ref  : (S*Bp, I)    input, flattened over (time, padded batch)
    wih_ref : (I, 4H)      input->gates weights (transposed, PyTorch i,f,g,o)
    whh_ref : (H, 4H)      hidden->gates weights (transposed)
    b_ref   : (1, 4H)      combined bias (b_ih + b_hh)
    wreg_ref: (H, 128)     Linear head weights, zero-padded to 128 lanes
    breg_ref: (1, 128)     Linear head bias, zero-padded to 128 lanes
    out_ref : (S*Bp, 128)  lane-dense output; column 0 holds the regression out
    gx_sc   : (S*Bp, 4H)   scratch: hoisted input-side gate pre-activations
    hs_sc   : (S*Bp, H)    scratch: hidden state for every (t, b) row
    """
    H = whh_ref.shape[0]
    Bp = batch_pad

    # ---- Prologue: input projection for ALL time steps in one matmul --------
    gx_sc[...] = (
        jnp.dot(x2_ref[...], wih_ref[...], preferred_element_type=jnp.float32)
        + b_ref[...])

    # ---- Recurrence: only h @ W_hh + elementwise on the serial critical path
    def step(t, carry):
        h, c = carry                                          # (Bp, H) f32
        row = pl.multiple_of(t * Bp, Bp)
        gates = gx_sc[pl.ds(row, Bp), :] + jnp.dot(
            h, whh_ref[...], preferred_element_type=jnp.float32)  # (Bp, 4H)

        # Full-vreg transcendentals (EUP), then static lane slices per gate.
        sig = jax.nn.sigmoid(gates)
        th = jnp.tanh(gates)
        i_g = sig[:, 0 * H:1 * H]
        f_g = sig[:, 1 * H:2 * H]
        g_g = th[:, 2 * H:3 * H]
        o_g = sig[:, 3 * H:4 * H]

        c_new = f_g * c + i_g * g_g
        h_new = o_g * jnp.tanh(c_new)

        hs_sc[pl.ds(row, Bp), :] = h_new
        return h_new, c_new

    h0 = jnp.zeros((Bp, H), jnp.float32)
    c0 = jnp.zeros((Bp, H), jnp.float32)
    jax.lax.fori_loop(0, seq_len, step, (h0, c0), unroll=True)

    # ---- Epilogue: fused Linear head, single lane-dense writeback -----------
    out_ref[...] = (
        jnp.dot(hs_sc[...], wreg_ref[...], preferred_element_type=jnp.float32)
        + breg_ref[...]).astype(out_ref.dtype)


def lstm_reg_forward(x, params):
    """x: (seq, batch, input_size) float32.  Returns (seq, batch, output_size)."""
    S, B, I = x.shape
    w_ih = params["w_ih"]          # (4H, I)  PyTorch layout
    w_hh = params["w_hh"]          # (4H, H)
    b_ih = params["b_ih"]          # (4H,)
    b_hh = params["b_hh"]          # (4H,)
    w_reg = params["w_reg"]        # (O, H)
    b_reg = params["b_reg"]        # (O,)
    H = w_hh.shape[1]
    O = w_reg.shape[0]

    Bp = ((max(B, 8) + 7) // 8) * 8        # pad batch to a sublane multiple
    LANES = ((max(O, 128) + 127) // 128) * 128  # lane-dense padded head width

    # Zero-pad batch and flatten (time, batch) into rows.
    x_p = jnp.zeros((S, Bp, I), jnp.float32).at[:, :B, :].set(
        x.astype(jnp.float32))
    x2 = x_p.reshape(S * Bp, I)

    # Pre-transpose / pad weights (kept f32: elementwise recurrence stays f32).
    wih_t = jnp.asarray(w_ih.T, jnp.float32)                    # (I, 4H)
    whh_t = jnp.asarray(w_hh.T, jnp.float32)                    # (H, 4H)
    b_all = jnp.asarray((b_ih + b_hh)[None, :], jnp.float32)    # (1, 4H)
    wreg_pad = jnp.zeros((H, LANES), jnp.float32).at[:, :O].set(
        jnp.asarray(w_reg.T, jnp.float32))                      # (H, 128)
    breg_pad = jnp.zeros((1, LANES), jnp.float32).at[0, :O].set(
        jnp.asarray(b_reg, jnp.float32))                        # (1, 128)

    kernel = functools.partial(lstm_reg_kernel, seq_len=S, batch_pad=Bp)

    grid_spec = pltpu.PrefetchScalarGridSpec(
        num_scalar_prefetch=0,
        grid=(1,),                     # single invocation; recurrence in-kernel
        in_specs=[
            pl.BlockSpec((S * Bp, I), lambda i: (0, 0)),
            pl.BlockSpec((I, 4 * H), lambda i: (0, 0)),
            pl.BlockSpec((H, 4 * H), lambda i: (0, 0)),
            pl.BlockSpec((1, 4 * H), lambda i: (0, 0)),
            pl.BlockSpec((H, LANES), lambda i: (0, 0)),
            pl.BlockSpec((1, LANES), lambda i: (0, 0)),
        ],
        out_specs=pl.BlockSpec((S * Bp, LANES), lambda i: (0, 0)),
        scratch_shapes=[
            pltpu.VMEM((S * Bp, 4 * H), jnp.float32),   # hoisted gate pre-acts
            pltpu.VMEM((S * Bp, H), jnp.float32),       # per-step hidden states
        ],
    )

    y_full = pl.pallas_call(
        kernel,
        out_shape=jax.ShapeDtypeStruct((S * Bp, LANES), jnp.float32),
        grid_spec=grid_spec,
        compiler_params=pltpu.CompilerParams(
            dimension_semantics=("arbitrary",)),
    )(x2, wih_t, whh_t, b_all, wreg_pad, breg_pad)

    # Drop batch / lane padding, restore (seq, batch, output_size).
    return y_full.reshape(S, Bp, LANES)[:, :B, :O]


def reference_forward(x, params):
    """Pure-JAX reference (lax.scan) matching PyTorch nn.LSTM + nn.Linear."""
    S, B, I = x.shape
    H = params["w_hh"].shape[1]
    wih_t = params["w_ih"].T
    whh_t = params["w_hh"].T
    b = params["b_ih"] + params["b_hh"]

    def step(carry, x_t):
        h, c = carry
        gates = x_t @ wih_t + h @ whh_t + b
        i = jax.nn.sigmoid(gates[:, 0 * H:1 * H])
        f = jax.nn.sigmoid(gates[:, 1 * H:2 * H])
        g = jnp.tanh(gates[:, 2 * H:3 * H])
        o = jax.nn.sigmoid(gates[:, 3 * H:4 * H])
        c = f * c + i * g
        h = o * jnp.tanh(c)
        return (h, c), h

    h0 = jnp.zeros((B, H), jnp.float32)
    c0 = jnp.zeros((B, H), jnp.float32)
    _, hs = jax.lax.scan(step, (h0, c0), x)                    # (S, B, H)
    y = hs.reshape(S * B, H) @ params["w_reg"].T + params["b_reg"]
    return y.reshape(S, B, -1)


if __name__ == "__main__":
    # Small shapes consistent with the module: seq=8, batch=4, input=4,
    # hidden=32, output=1, num_layers=1.
    S, B, I, H, O = 8, 4, 4, 32, 1

    key = jax.random.PRNGKey(0)
    keys = jax.random.split(key, 7)
    scale = 1.0 / jnp.sqrt(H)   # PyTorch-style uniform(-1/sqrt(H), 1/sqrt(H))
    params = {
        "w_ih": jax.random.uniform(keys[0], (4 * H, I), jnp.float32, -scale, scale),
        "w_hh": jax.random.uniform(keys[1], (4 * H, H), jnp.float32, -scale, scale),
        "b_ih": jax.random.uniform(keys[2], (4 * H,), jnp.float32, -scale, scale),
        "b_hh": jax.random.uniform(keys[3], (4 * H,), jnp.float32, -scale, scale),
        "w_reg": jax.random.uniform(keys[4], (O, H), jnp.float32, -scale, scale),
        "b_reg": jax.random.uniform(keys[5], (O,), jnp.float32, -scale, scale),
    }
    x = jax.random.normal(keys[6], (S, B, I), jnp.float32)

    out = lstm_reg_forward(x, params)
    out = jax.block_until_ready(out)

    ref = reference_forward(x, params)
    assert out.shape == (S, B, O)
    assert jnp.allclose(out, ref, atol=1e-5, rtol=1e-5), "mismatch vs reference"

    print("KERNEL_OK")
</pallas_src>

<mosaic_0001>
module attributes {stable_mosaic.version = 11 : i64} {
  func.func @lstm_reg_kernel(%arg0: i32, %arg1: memref<64x4xf32, #tpu.memory_space<vmem>>, %arg2: memref<4x128xf32, #tpu.memory_space<vmem>>, %arg3: memref<32x128xf32, #tpu.memory_space<vmem>>, %arg4: memref<1x128xf32, #tpu.memory_space<vmem>>, %arg5: memref<32x128xf32, #tpu.memory_space<vmem>>, %arg6: memref<1x128xf32, #tpu.memory_space<vmem>>, %arg7: memref<64x128xf32, #tpu.memory_space<vmem>>, %arg8: memref<64x128xf32, #tpu.memory_space<vmem>>, %arg9: memref<64x32xf32, #tpu.memory_space<vmem>>) attributes {dimension_semantics = [#tpu.dimension_semantics<arbitrary>], iteration_bounds = array<i64: 1>, scalar_prefetch = 0 : i64, scratch_operands = 2 : i64, tpu.core_type = #tpu.core_type<tc>, window_params = [{pipeline_mode = #tpu.pipeline_mode<synchronous>, transform_indices = @transform_0, window_bounds = array<i64: 64, 4>}, {pipeline_mode = #tpu.pipeline_mode<synchronous>, transform_indices = @transform_1, window_bounds = array<i64: 4, 128>}, {pipeline_mode = #tpu.pipeline_mode<synchronous>, transform_indices = @transform_2, window_bounds = array<i64: 32, 128>}, {pipeline_mode = #tpu.pipeline_mode<synchronous>, transform_indices = @transform_3, window_bounds = array<i64: 1, 128>}, {pipeline_mode = #tpu.pipeline_mode<synchronous>, transform_indices = @transform_4, window_bounds = array<i64: 32, 128>}, {pipeline_mode = #tpu.pipeline_mode<synchronous>, transform_indices = @transform_5, window_bounds = array<i64: 1, 128>}, {pipeline_mode = #tpu.pipeline_mode<synchronous>, transform_indices = @transform_6, window_bounds = array<i64: 64, 128>}]} {
    %c0 = arith.constant 0 : index
    %c0_0 = arith.constant 0 : index
    %0 = vector.load %arg1[%c0, %c0_0] : memref<64x4xf32, #tpu.memory_space<vmem>>, vector<64x4xf32>
    %c0_1 = arith.constant 0 : index
    %c0_2 = arith.constant 0 : index
    %1 = vector.load %arg2[%c0_1, %c0_2] : memref<4x128xf32, #tpu.memory_space<vmem>>, vector<4x128xf32>
    %cst = arith.constant dense<0.000000e+00> : vector<64x128xf32>
    %2 = tpu.matmul %0, %1, %cst {dimension_numbers = #tpu.dot_dimension_numbers<[1], [0], [0], [1], [0, 0, 1, 1], [], []>} : vector<64x4xf32>, vector<4x128xf32>, vector<64x128xf32> -> vector<64x128xf32>
    %c0_3 = arith.constant 0 : index
    %c0_4 = arith.constant 0 : index
    %3 = vector.load %arg4[%c0_3, %c0_4] : memref<1x128xf32, #tpu.memory_space<vmem>>, vector<1x128xf32>
    %4 = vector.broadcast %3 : vector<1x128xf32> to vector<64x128xf32>
    %5 = arith.addf %2, %4 : vector<64x128xf32>
    %c0_5 = arith.constant 0 : index
    %c0_6 = arith.constant 0 : index
    %6 = vector.load %arg8[%c0_5, %c0_6] : memref<64x128xf32, #tpu.memory_space<vmem>>, vector<64x128xf32>
    tpu.vector_store %arg8[%c0_5, %c0_6], %5 {strides = array<i32>} : memref<64x128xf32, #tpu.memory_space<vmem>>, vector<64x128xf32>,
    %cst_7 = arith.constant 0.000000e+00 : f32
    %7 = vector.broadcast %cst_7 : f32 to vector<8x32xf32>
    %cst_8 = arith.constant 0.000000e+00 : f32
    %8 = vector.broadcast %cst_8 : f32 to vector<8x32xf32>
    %c0_i32 = arith.constant 0 : i32
    %c8_i32 = arith.constant 8 : i32
    %9 = arith.muli %c0_i32, %c8_i32 : i32
    %10 = tpu.assume_multiple %9, 8 : i32
    %11 = arith.index_cast %10 : i32 to index
    %c0_9 = arith.constant 0 : index
    %12 = vector.load %arg8[%11, %c0_9] : memref<64x128xf32, #tpu.memory_space<vmem>>, vector<8x128xf32>
    %c0_10 = arith.constant 0 : index
    %c0_11 = arith.constant 0 : index
    %13 = vector.load %arg3[%c0_10, %c0_11] : memref<32x128xf32, #tpu.memory_space<vmem>>, vector<32x128xf32>
    %cst_12 = arith.constant dense<0.000000e+00> : vector<8x128xf32>
    %14 = tpu.matmul %7, %13, %cst_12 {dimension_numbers = #tpu.dot_dimension_numbers<[1], [0], [0], [1], [0, 0, 1, 1], [], []>} : vector<8x32xf32>, vector<32x128xf32>, vector<8x128xf32> -> vector<8x128xf32>
    %15 = arith.addf %12, %14 : vector<8x128xf32>
    %16 = arith.negf %15 : vector<8x128xf32>
    %17 = math.exp %16 : vector<8x128xf32>
    %cst_13 = arith.constant 1.000000e+00 : f32
    %18 = vector.broadcast %cst_13 : f32 to vector<8x128xf32>
    %19 = arith.addf %18, %17 : vector<8x128xf32>
    %20 = arith.divf %18, %19 : vector<8x128xf32>
    %21 = math.tanh %15 : vector<8x128xf32>
    %22 = vector.extract_strided_slice %20 {offsets = [0, 0], sizes = [8, 32], strides = [1, 1]} : vector<8x128xf32> to vector<8x32xf32>
    %23 = vector.extract_strided_slice %20 {offsets = [0, 32], sizes = [8, 32], strides = [1, 1]} : vector<8x128xf32> to vector<8x32xf32>
    %24 = vector.extract_strided_slice %21 {offsets = [0, 64], sizes = [8, 32], strides = [1, 1]} : vector<8x128xf32> to vector<8x32xf32>
    %25 = vector.extract_strided_slice %20 {offsets = [0, 96], sizes = [8, 32], strides = [1, 1]} : vector<8x128xf32> to vector<8x32xf32>
    %26 = arith.mulf %23, %8 : vector<8x32xf32>
    %27 = arith.mulf %22, %24 : vector<8x32xf32>
    %28 = arith.addf %26, %27 : vector<8x32xf32>
    %29 = math.tanh %28 : vector<8x32xf32>
    %30 = arith.mulf %25, %29 : vector<8x32xf32>
    %31 = arith.index_cast %10 : i32 to index
    %c0_14 = arith.constant 0 : index
    %32 = vector.load %arg9[%31, %c0_14] : memref<64x32xf32, #tpu.memory_space<vmem>>, vector<8x32xf32>
    tpu.vector_store %arg9[%31, %c0_14], %30 {strides = array<i32>} : memref<64x32xf32, #tpu.memory_space<vmem>>, vector<8x32xf32>,
    %c1_i32 = arith.constant 1 : i32
    %c8_i32_15 = arith.constant 8 : i32
    %33 = arith.muli %c1_i32, %c8_i32_15 : i32
    %34 = tpu.assume_multiple %33, 8 : i32
    %35 = arith.index_cast %34 : i32 to index
    %c0_16 = arith.constant 0 : index
    %36 = vector.load %arg8[%35, %c0_16] : memref<64x128xf32, #tpu.memory_space<vmem>>, vector<8x128xf32>
    %c0_17 = arith.constant 0 : index
    %c0_18 = arith.constant 0 : index
    %37 = vector.load %arg3[%c0_17, %c0_18] : memref<32x128xf32, #tpu.memory_space<vmem>>, vector<32x128xf32>
    %cst_19 = arith.constant dense<0.000000e+00> : vector<8x128xf32>
    %38 = tpu.matmul %30, %37, %cst_19 {dimension_numbers = #tpu.dot_dimension_numbers<[1], [0], [0], [1], [0, 0, 1, 1], [], []>} : vector<8x32xf32>, vector<32x128xf32>, vector<8x128xf32> -> vector<8x128xf32>
    %39 = arith.addf %36, %38 : vector<8x128xf32>
    %40 = arith.negf %39 : vector<8x128xf32>
    %41 = math.exp %40 : vector<8x128xf32>
    %cst_20 = arith.constant 1.000000e+00 : f32
    %42 = vector.broadcast %cst_20 : f32 to vector<8x128xf32>
    %43 = arith.addf %42, %41 : vector<8x128xf32>
    %44 = arith.divf %42, %43 : vector<8x128xf32>
    %45 = math.tanh %39 : vector<8x128xf32>
    %46 = vector.extract_strided_slice %44 {offsets = [0, 0], sizes = [8, 32], strides = [1, 1]} : vector<8x128xf32> to vector<8x32xf32>
    %47 = vector.extract_strided_slice %44 {offsets = [0, 32], sizes = [8, 32], strides = [1, 1]} : vector<8x128xf32> to vector<8x32xf32>
    %48 = vector.extract_strided_slice %45 {offsets = [0, 64], sizes = [8, 32], strides = [1, 1]} : vector<8x128xf32> to vector<8x32xf32>
    %49 = vector.extract_strided_slice %44 {offsets = [0, 96], sizes = [8, 32], strides = [1, 1]} : vector<8x128xf32> to vector<8x32xf32>
    %50 = arith.mulf %47, %28 : vector<8x32xf32>
    %51 = arith.mulf %46, %48 : vector<8x32xf32>
    %52 = arith.addf %50, %51 : vector<8x32xf32>
    %53 = math.tanh %52 : vector<8x32xf32>
    %54 = arith.mulf %49, %53 : vector<8x32xf32>
    %55 = arith.index_cast %34 : i32 to index
    %c0_21 = arith.constant 0 : index
    %56 = vector.load %arg9[%55, %c0_21] : memref<64x32xf32, #tpu.memory_space<vmem>>, vector<8x32xf32>
    tpu.vector_store %arg9[%55, %c0_21], %54 {strides = array<i32>} : memref<64x32xf32, #tpu.memory_space<vmem>>, vector<8x32xf32>,
    %c2_i32 = arith.constant 2 : i32
    %c8_i32_22 = arith.constant 8 : i32
    %57 = arith.muli %c2_i32, %c8_i32_22 : i32
    %58 = tpu.assume_multiple %57, 8 : i32
    %59 = arith.index_cast %58 : i32 to index
    %c0_23 = arith.constant 0 : index
    %60 = vector.load %arg8[%59, %c0_23] : memref<64x128xf32, #tpu.memory_space<vmem>>, vector<8x128xf32>
    %c0_24 = arith.constant 0 : index
    %c0_25 = arith.constant 0 : index
    %61 = vector.load %arg3[%c0_24, %c0_25] : memref<32x128xf32, #tpu.memory_space<vmem>>, vector<32x128xf32>
    %cst_26 = arith.constant dense<0.000000e+00> : vector<8x128xf32>
    %62 = tpu.matmul %54, %61, %cst_26 {dimension_numbers = #tpu.dot_dimension_numbers<[1], [0], [0], [1], [0, 0, 1, 1], [], []>} : vector<8x32xf32>, vector<32x128xf32>, vector<8x128xf32> -> vector<8x128xf32>
    %63 = arith.addf %60, %62 : vector<8x128xf32>
    %64 = arith.negf %63 : vector<8x128xf32>
    %65 = math.exp %64 : vector<8x128xf32>
    %cst_27 = arith.constant 1.000000e+00 : f32
    %66 = vector.broadcast %cst_27 : f32 to vector<8x128xf32>
    %67 = arith.addf %66, %65 : vector<8x128xf32>
    %68 = arith.divf %66, %67 : vector<8x128xf32>
    %69 = math.tanh %63 : vector<8x128xf32>
    %70 = vector.extract_strided_slice %68 {offsets = [0, 0], sizes = [8, 32], strides = [1, 1]} : vector<8x128xf32> to vector<8x32xf32>
    %71 = vector.extract_strided_slice %68 {offsets = [0, 32], sizes = [8, 32], strides = [1, 1]} : vector<8x128xf32> to vector<8x32xf32>
    %72 = vector.extract_strided_slice %69 {offsets = [0, 64], sizes = [8, 32], strides = [1, 1]} : vector<8x128xf32> to vector<8x32xf32>
    %73 = vector.extract_strided_slice %68 {offsets = [0, 96], sizes = [8, 32], strides = [1, 1]} : vector<8x128xf32> to vector<8x32xf32>
    %74 = arith.mulf %71, %52 : vector<8x32xf32>
    %75 = arith.mulf %70, %72 : vector<8x32xf32>
    %76 = arith.addf %74, %75 : vector<8x32xf32>
    %77 = math.tanh %76 : vector<8x32xf32>
    %78 = arith.mulf %73, %77 : vector<8x32xf32>
    %79 = arith.index_cast %58 : i32 to index
    %c0_28 = arith.constant 0 : index
    %80 = vector.load %arg9[%79, %c0_28] : memref<64x32xf32, #tpu.memory_space<vmem>>, vector<8x32xf32>
    tpu.vector_store %arg9[%79, %c0_28], %78 {strides = array<i32>} : memref<64x32xf32, #tpu.memory_space<vmem>>, vector<8x32xf32>,
    %c3_i32 = arith.constant 3 : i32
    %c8_i32_29 = arith.constant 8 : i32
    %81 = arith.muli %c3_i32, %c8_i32_29 : i32
    %82 = tpu.assume_multiple %81, 8 : i32
    %83 = arith.index_cast %82 : i32 to index
    %c0_30 = arith.constant 0 : index
    %84 = vector.load %arg8[%83, %c0_30] : memref<64x128xf32, #tpu.memory_space<vmem>>, vector<8x128xf32>
    %c0_31 = arith.constant 0 : index
    %c0_32 = arith.constant 0 : index
    %85 = vector.load %arg3[%c0_31, %c0_32] : memref<32x128xf32, #tpu.memory_space<vmem>>, vector<32x128xf32>
    %cst_33 = arith.constant dense<0.000000e+00> : vector<8x128xf32>
    %86 = tpu.matmul %78, %85, %cst_33 {dimension_numbers = #tpu.dot_dimension_numbers<[1], [0], [0], [1], [0, 0, 1, 1], [], []>} : vector<8x32xf32>, vector<32x128xf32>, vector<8x128xf32> -> vector<8x128xf32>
    %87 = arith.addf %84, %86 : vector<8x128xf32>
    %88 = arith.negf %87 : vector<8x128xf32>
    %89 = math.exp %88 : vector<8x128xf32>
    %cst_34 = arith.constant 1.000000e+00 : f32
    %90 = vector.broadcast %cst_34 : f32 to vector<8x128xf32>
    %91 = arith.addf %90, %89 : vector<8x128xf32>
    %92 = arith.divf %90, %91 : vector<8x128xf32>
    %93 = math.tanh %87 : vector<8x128xf32>
    %94 = vector.extract_strided_slice %92 {offsets = [0, 0], sizes = [8, 32], strides = [1, 1]} : vector<8x128xf32> to vector<8x32xf32>
    %95 = vector.extract_strided_slice %92 {offsets = [0, 32], sizes = [8, 32], strides = [1, 1]} : vector<8x128xf32> to vector<8x32xf32>
    %96 = vector.extract_strided_slice %93 {offsets = [0, 64], sizes = [8, 32], strides = [1, 1]} : vector<8x128xf32> to vector<8x32xf32>
    %97 = vector.extract_strided_slice %92 {offsets = [0, 96], sizes = [8, 32], strides = [1, 1]} : vector<8x128xf32> to vector<8x32xf32>
    %98 = arith.mulf %95, %76 : vector<8x32xf32>
    %99 = arith.mulf %94, %96 : vector<8x32xf32>
    %100 = arith.addf %98, %99 : vector<8x32xf32>
    %101 = math.tanh %100 : vector<8x32xf32>
    %102 = arith.mulf %97, %101 : vector<8x32xf32>
    %103 = arith.index_cast %82 : i32 to index
    %c0_35 = arith.constant 0 : index
    %104 = vector.load %arg9[%103, %c0_35] : memref<64x32xf32, #tpu.memory_space<vmem>>, vector<8x32xf32>
    tpu.vector_store %arg9[%103, %c0_35], %102 {strides = array<i32>} : memref<64x32xf32, #tpu.memory_space<vmem>>, vector<8x32xf32>,
    %c4_i32 = arith.constant 4 : i32
    %c8_i32_36 = arith.constant 8 : i32
    %105 = arith.muli %c4_i32, %c8_i32_36 : i32
    %106 = tpu.assume_multiple %105, 8 : i32
    %107 = arith.index_cast %106 : i32 to index
    %c0_37 = arith.constant 0 : index
    %108 = vector.load %arg8[%107, %c0_37] : memref<64x128xf32, #tpu.memory_space<vmem>>, vector<8x128xf32>
    %c0_38 = arith.constant 0 : index
    %c0_39 = arith.constant 0 : index
    %109 = vector.load %arg3[%c0_38, %c0_39] : memref<32x128xf32, #tpu.memory_space<vmem>>, vector<32x128xf32>
    %cst_40 = arith.constant dense<0.000000e+00> : vector<8x128xf32>
    %110 = tpu.matmul %102, %109, %cst_40 {dimension_numbers = #tpu.dot_dimension_numbers<[1], [0], [0], [1], [0, 0, 1, 1], [], []>} : vector<8x32xf32>, vector<32x128xf32>, vector<8x128xf32> -> vector<8x128xf32>
    %111 = arith.addf %108, %110 : vector<8x128xf32>
    %112 = arith.negf %111 : vector<8x128xf32>
    %113 = math.exp %112 : vector<8x128xf32>
    %cst_41 = arith.constant 1.000000e+00 : f32
    %114 = vector.broadcast %cst_41 : f32 to vector<8x128xf32>
    %115 = arith.addf %114, %113 : vector<8x128xf32>
    %116 = arith.divf %114, %115 : vector<8x128xf32>
    %117 = math.tanh %111 : vector<8x128xf32>
    %118 = vector.extract_strided_slice %116 {offsets = [0, 0], sizes = [8, 32], strides = [1, 1]} : vector<8x128xf32> to vector<8x32xf32>
    %119 = vector.extract_strided_slice %116 {offsets = [0, 32], sizes = [8, 32], strides = [1, 1]} : vector<8x128xf32> to vector<8x32xf32>
    %120 = vector.extract_strided_slice %117 {offsets = [0, 64], sizes = [8, 32], strides = [1, 1]} : vector<8x128xf32> to vector<8x32xf32>
    %121 = vector.extract_strided_slice %116 {offsets = [0, 96], sizes = [8, 32], strides = [1, 1]} : vector<8x128xf32> to vector<8x32xf32>
    %122 = arith.mulf %119, %100 : vector<8x32xf32>
    %123 = arith.mulf %118, %120 : vector<8x32xf32>
    %124 = arith.addf %122, %123 : vector<8x32xf32>
    %125 = math.tanh %124 : vector<8x32xf32>
    %126 = arith.mulf %121, %125 : vector<8x32xf32>
    %127 = arith.index_cast %106 : i32 to index
    %c0_42 = arith.constant 0 : index
    %128 = vector.load %arg9[%127, %c0_42] : memref<64x32xf32, #tpu.memory_space<vmem>>, vector<8x32xf32>
    tpu.vector_store %arg9[%127, %c0_42], %126 {strides = array<i32>} : memref<64x32xf32, #tpu.memory_space<vmem>>, vector<8x32xf32>,
    %c5_i32 = arith.constant 5 : i32
    %c8_i32_43 = arith.constant 8 : i32
    %129 = arith.muli %c5_i32, %c8_i32_43 : i32
    %130 = tpu.assume_multiple %129, 8 : i32
    %131 = arith.index_cast %130 : i32 to index
    %c0_44 = arith.constant 0 : index
    %132 = vector.load %arg8[%131, %c0_44] : memref<64x128xf32, #tpu.memory_space<vmem>>, vector<8x128xf32>
    %c0_45 = arith.constant 0 : index
    %c0_46 = arith.constant 0 : index
    %133 = vector.load %arg3[%c0_45, %c0_46] : memref<32x128xf32, #tpu.memory_space<vmem>>, vector<32x128xf32>
    %cst_47 = arith.constant dense<0.000000e+00> : vector<8x128xf32>
    %134 = tpu.matmul %126, %133, %cst_47 {dimension_numbers = #tpu.dot_dimension_numbers<[1], [0], [0], [1], [0, 0, 1, 1], [], []>} : vector<8x32xf32>, vector<32x128xf32>, vector<8x128xf32> -> vector<8x128xf32>
    %135 = arith.addf %132, %134 : vector<8x128xf32>
    %136 = arith.negf %135 : vector<8x128xf32>
    %137 = math.exp %136 : vector<8x128xf32>
    %cst_48 = arith.constant 1.000000e+00 : f32
    %138 = vector.broadcast %cst_48 : f32 to vector<8x128xf32>
    %139 = arith.addf %138, %137 : vector<8x128xf32>
    %140 = arith.divf %138, %139 : vector<8x128xf32>
    %141 = math.tanh %135 : vector<8x128xf32>
    %142 = vector.extract_strided_slice %140 {offsets = [0, 0], sizes = [8, 32], strides = [1, 1]} : vector<8x128xf32> to vector<8x32xf32>
    %143 = vector.extract_strided_slice %140 {offsets = [0, 32], sizes = [8, 32], strides = [1, 1]} : vector<8x128xf32> to vector<8x32xf32>
    %144 = vector.extract_strided_slice %141 {offsets = [0, 64], sizes = [8, 32], strides = [1, 1]} : vector<8x128xf32> to vector<8x32xf32>
    %145 = vector.extract_strided_slice %140 {offsets = [0, 96], sizes = [8, 32], strides = [1, 1]} : vector<8x128xf32> to vector<8x32xf32>
    %146 = arith.mulf %143, %124 : vector<8x32xf32>
    %147 = arith.mulf %142, %144 : vector<8x32xf32>
    %148 = arith.addf %146, %147 : vector<8x32xf32>
    %149 = math.tanh %148 : vector<8x32xf32>
    %150 = arith.mulf %145, %149 : vector<8x32xf32>
    %151 = arith.index_cast %130 : i32 to index
    %c0_49 = arith.constant 0 : index
    %152 = vector.load %arg9[%151, %c0_49] : memref<64x32xf32, #tpu.memory_space<vmem>>, vector<8x32xf32>
    tpu.vector_store %arg9[%151, %c0_49], %150 {strides = array<i32>} : memref<64x32xf32, #tpu.memory_space<vmem>>, vector<8x32xf32>,
    %c6_i32 = arith.constant 6 : i32
    %c8_i32_50 = arith.constant 8 : i32
    %153 = arith.muli %c6_i32, %c8_i32_50 : i32
    %154 = tpu.assume_multiple %153, 8 : i32
    %155 = arith.index_cast %154 : i32 to index
    %c0_51 = arith.constant 0 : index
    %156 = vector.load %arg8[%155, %c0_51] : memref<64x128xf32, #tpu.memory_space<vmem>>, vector<8x128xf32>
    %c0_52 = arith.constant 0 : index
    %c0_53 = arith.constant 0 : index
    %157 = vector.load %arg3[%c0_52, %c0_53] : memref<32x128xf32, #tpu.memory_space<vmem>>, vector<32x128xf32>
    %cst_54 = arith.constant dense<0.000000e+00> : vector<8x128xf32>
    %158 = tpu.matmul %150, %157, %cst_54 {dimension_numbers = #tpu.dot_dimension_numbers<[1], [0], [0], [1], [0, 0, 1, 1], [], []>} : vector<8x32xf32>, vector<32x128xf32>, vector<8x128xf32> -> vector<8x128xf32>
    %159 = arith.addf %156, %158 : vector<8x128xf32>
    %160 = arith.negf %159 : vector<8x128xf32>
    %161 = math.exp %160 : vector<8x128xf32>
    %cst_55 = arith.constant 1.000000e+00 : f32
    %162 = vector.broadcast %cst_55 : f32 to vector<8x128xf32>
    %163 = arith.addf %162, %161 : vector<8x128xf32>
    %164 = arith.divf %162, %163 : vector<8x128xf32>
    %165 = math.tanh %159 : vector<8x128xf32>
    %166 = vector.extract_strided_slice %164 {offsets = [0, 0], sizes = [8, 32], strides = [1, 1]} : vector<8x128xf32> to vector<8x32xf32>
    %167 = vector.extract_strided_slice %164 {offsets = [0, 32], sizes = [8, 32], strides = [1, 1]} : vector<8x128xf32> to vector<8x32xf32>
    %168 = vector.extract_strided_slice %165 {offsets = [0, 64], sizes = [8, 32], strides = [1, 1]} : vector<8x128xf32> to vector<8x32xf32>
    %169 = vector.extract_strided_slice %164 {offsets = [0, 96], sizes = [8, 32], strides = [1, 1]} : vector<8x128xf32> to vector<8x32xf32>
    %170 = arith.mulf %167, %148 : vector<8x32xf32>
    %171 = arith.mulf %166, %168 : vector<8x32xf32>
    %172 = arith.addf %170, %171 : vector<8x32xf32>
    %173 = math.tanh %172 : vector<8x32xf32>
    %174 = arith.mulf %169, %173 : vector<8x32xf32>
    %175 = arith.index_cast %154 : i32 to index
    %c0_56 = arith.constant 0 : index
    %176 = vector.load %arg9[%175, %c0_56] : memref<64x32xf32, #tpu.memory_space<vmem>>, vector<8x32xf32>
    tpu.vector_store %arg9[%175, %c0_56], %174 {strides = array<i32>} : memref<64x32xf32, #tpu.memory_space<vmem>>, vector<8x32xf32>,
    %c7_i32 = arith.constant 7 : i32
    %c8_i32_57 = arith.constant 8 : i32
    %177 = arith.muli %c7_i32, %c8_i32_57 : i32
    %178 = tpu.assume_multiple %177, 8 : i32
    %179 = arith.index_cast %178 : i32 to index
    %c0_58 = arith.constant 0 : index
    %180 = vector.load %arg8[%179, %c0_58] : memref<64x128xf32, #tpu.memory_space<vmem>>, vector<8x128xf32>
    %c0_59 = arith.constant 0 : index
    %c0_60 = arith.constant 0 : index
    %181 = vector.load %arg3[%c0_59, %c0_60] : memref<32x128xf32, #tpu.memory_space<vmem>>, vector<32x128xf32>
    %cst_61 = arith.constant dense<0.000000e+00> : vector<8x128xf32>
    %182 = tpu.matmul %174, %181, %cst_61 {dimension_numbers = #tpu.dot_dimension_numbers<[1], [0], [0], [1], [0, 0, 1, 1], [], []>} : vector<8x32xf32>, vector<32x128xf32>, vector<8x128xf32> -> vector<8x128xf32>
    %183 = arith.addf %180, %182 : vector<8x128xf32>
    %184 = arith.negf %183 : vector<8x128xf32>
    %185 = math.exp %184 : vector<8x128xf32>
    %cst_62 = arith.constant 1.000000e+00 : f32
    %186 = vector.broadcast %cst_62 : f32 to vector<8x128xf32>
    %187 = arith.addf %186, %185 : vector<8x128xf32>
    %188 = arith.divf %186, %187 : vector<8x128xf32>
    %189 = math.tanh %183 : vector<8x128xf32>
    %190 = vector.extract_strided_slice %188 {offsets = [0, 0], sizes = [8, 32], strides = [1, 1]} : vector<8x128xf32> to vector<8x32xf32>
    %191 = vector.extract_strided_slice %188 {offsets = [0, 32], sizes = [8, 32], strides = [1, 1]} : vector<8x128xf32> to vector<8x32xf32>
    %192 = vector.extract_strided_slice %189 {offsets = [0, 64], sizes = [8, 32], strides = [1, 1]} : vector<8x128xf32> to vector<8x32xf32>
    %193 = vector.extract_strided_slice %188 {offsets = [0, 96], sizes = [8, 32], strides = [1, 1]} : vector<8x128xf32> to vector<8x32xf32>
    %194 = arith.mulf %191, %172 : vector<8x32xf32>
    %195 = arith.mulf %190, %192 : vector<8x32xf32>
    %196 = arith.addf %194, %195 : vector<8x32xf32>
    %197 = math.tanh %196 : vector<8x32xf32>
    %198 = arith.mulf %193, %197 : vector<8x32xf32>
    %199 = arith.index_cast %178 : i32 to index
    %c0_63 = arith.constant 0 : index
    %200 = vector.load %arg9[%199, %c0_63] : memref<64x32xf32, #tpu.memory_space<vmem>>, vector<8x32xf32>
    tpu.vector_store %arg9[%199, %c0_63], %198 {strides = array<i32>} : memref<64x32xf32, #tpu.memory_space<vmem>>, vector<8x32xf32>,
    %c8_i32_64 = arith.constant 8 : i32
    %c0_65 = arith.constant 0 : index
    %c0_66 = arith.constant 0 : index
    %201 = vector.load %arg9[%c0_65, %c0_66] : memref<64x32xf32, #tpu.memory_space<vmem>>, vector<64x32xf32>
    %c0_67 = arith.constant 0 : index
    %c0_68 = arith.constant 0 : index
    %202 = vector.load %arg5[%c0_67, %c0_68] : memref<32x128xf32, #tpu.memory_space<vmem>>, vector<32x128xf32>
    %cst_69 = arith.constant dense<0.000000e+00> : vector<64x128xf32>
    %203 = tpu.matmul %201, %202, %cst_69 {dimension_numbers = #tpu.dot_dimension_numbers<[1], [0], [0], [1], [0, 0, 1, 1], [], []>} : vector<64x32xf32>, vector<32x128xf32>, vector<64x128xf32> -> vector<64x128xf32>
    %c0_70 = arith.constant 0 : index
    %c0_71 = arith.constant 0 : index
    %204 = vector.load %arg6[%c0_70, %c0_71] : memref<1x128xf32, #tpu.memory_space<vmem>>, vector<1x128xf32>
    %205 = vector.broadcast %204 : vector<1x128xf32> to vector<64x128xf32>
    %206 = arith.addf %203, %205 : vector<64x128xf32>
    %c0_72 = arith.constant 0 : index
    %c0_73 = arith.constant 0 : index
    %207 = vector.load %arg7[%c0_72, %c0_73] : memref<64x128xf32, #tpu.memory_space<vmem>>, vector<64x128xf32>
    tpu.vector_store %arg7[%c0_72, %c0_73], %206 {strides = array<i32>} : memref<64x128xf32, #tpu.memory_space<vmem>>, vector<64x128xf32>,
    return
  }
  func.func @transform_0(%arg0: i32) -> (i32, i32) {
    %c0_i32 = arith.constant 0 : i32
    %c0_i32_0 = arith.constant 0 : i32
    %c0_i32_1 = arith.constant 0 : i32
    return %c0_i32, %c0_i32_0 : i32, i32
  }
  func.func @transform_1(%arg0: i32) -> (i32, i32) {
    %c0_i32 = arith.constant 0 : i32
    %c0_i32_0 = arith.constant 0 : i32
    %c0_i32_1 = arith.constant 0 : i32
    return %c0_i32, %c0_i32_0 : i32, i32
  }
  func.func @transform_2(%arg0: i32) -> (i32, i32) {
    %c0_i32 = arith.constant 0 : i32
    %c0_i32_0 = arith.constant 0 : i32
    %c0_i32_1 = arith.constant 0 : i32
    return %c0_i32, %c0_i32_0 : i32, i32
  }
  func.func @transform_3(%arg0: i32) -> (i32, i32) {
    %c0_i32 = arith.constant 0 : i32
    %c0_i32_0 = arith.constant 0 : i32
    %c0_i32_1 = arith.constant 0 : i32
    return %c0_i32, %c0_i32_0 : i32, i32
  }
  func.func @transform_4(%arg0: i32) -> (i32, i32) {
    %c0_i32 = arith.constant 0 : i32
    %c0_i32_0 = arith.constant 0 : i32
    %c0_i32_1 = arith.constant 0 : i32
    return %c0_i32, %c0_i32_0 : i32, i32
  }
  func.func @transform_5(%arg0: i32) -> (i32, i32) {
    %c0_i32 = arith.constant 0 : i32
    %c0_i32_0 = arith.constant 0 : i32
    %c0_i32_1 = arith.constant 0 : i32
    return %c0_i32, %c0_i32_0 : i32, i32
  }
  func.func @transform_6(%arg0: i32) -> (i32, i32) {
    %c0_i32 = arith.constant 0 : i32
    %c0_i32_0 = arith.constant 0 : i32
    %c0_i32_1 = arith.constant 0 : i32
    return %c0_i32, %c0_i32_0 : i32, i32
  }
}

</mosaic_0001>

<bundles_post_ra>
// kernel: tpu_custom_call.1
= control target key start
LH: loop header
LB: loop body
LE: loop exit
PB: predicated region body
PF: predicated region fallthrough
CT: control target
= control target key end

     0   :  { %vm65_vm0 = vcmask 1043456   ;;  %vm40_vm1 = vcmask 31744   ;;  %v1597_v8 = vmov 0.0|0.0   ;;  %s1865_s0 = inlined_call_operand.vmem [shape: f32[64,4], index: 0, kind: input, shape index: {}]   ;;  %s1866_s1 = inlined_call_operand.vmem [shape: f32[4,128], index: 1, kind: input, shape index: {}]   ;;  %s1867_s2 = inlined_call_operand.vmem [shape: f32[32,128], index: 2, kind: input, shape index: {}]   ;;  %s1868_s3 = inlined_call_operand.vmem [shape: f32[1,128], index: 3, kind: input, shape index: {}]   ;;  %s1869_s4 = inlined_call_operand.vmem [shape: f32[32,128], index: 4, kind: input, shape index: {}]   ;;  %s1870_s5 = inlined_call_operand.vmem [shape: f32[1,128], index: 5, kind: input, shape index: {}]   ;;  %s1871_s6 = inlined_call_operand.hbm [shape: f32[64,128], index: 6, kind: output, shape index: {}]  }
   0x1   :  { %v32_v0 = vld [vmem:[%s1866_s1] sm:$0xf]  ;;  %v29_v2 = vld [vmem:[%s1865_s0 + $0x28] sm:$0xff]  ;;  %v30_v5 = vld [vmem:[%s1865_s0 + $0x30] sm:$0xff] }
   0x2   :  { %v28_v1 = vld [vmem:[%s1865_s0 + $0x20] sm:$0xff]  ;;  %1499 = vmatprep.subr.msk.mxu1 %vm65_vm0, %v32_v0  ;;  %v184_v4 = vld [vmem:[%s1867_s2 + $0x8] sm:$0xff]  ;;  %1321 = vmatprep.subr.msk.mxu0 %vm65_vm0, %v32_v0  ;;  %v185_v10 = vld [vmem:[%s1867_s2 + $0x10] sm:$0xff] }
   0x3   :  { %1329 = vmatprep.mubr.msk.f32.mxu1 %vm40_vm1, %v28_v1  ;;  %v183_v3 = vld [vmem:[%s1867_s2] sm:$0xff]  ;;  %1500 = vmatpush3.msk.msra.mxu1 %vm65_vm0, %v32_v0  ;;  %v25_v9 = vld [vmem:[%s1865_s0 + $0x8] sm:$0xff]  ;;  %v186_v11 = vld [vmem:[%s1867_s2 + $0x18] sm:$0xff] }
   0x4   :  { %v1661_v6 = vpack.c.bf16 %v184_v4, %v183_v3  ;;  %v24_v7 = vld [vmem:[%s1865_s0] sm:$0xff]  ;;  %1330 = vmatmul.mubr.msk.f32.vlgmr.msra.gmra.mrb[0].mxu1 %vm40_vm1, %v29_v2  ;;  %1443 = vmatprep.subr.bf16.mxu1 %v1597_v8  ;;  %v31_v12 = vld [vmem:[%s1865_s0 + $0x38] sm:$0xff]  ;;  %v1683_v13 = vpack.c.bf16 %v186_v11, %v185_v10 }
   0x5   :  { %1332 = vmatprep.mubr.msk.f32.mxu1 %vm40_vm1, %v30_v5 }
   0x6   :  { %1445 = vmatpush3.bf16.msra.mxu1 %v1661_v6 }
   0x7   :  { %11 = vsyncpa [#allocation5], 0  ;;  %1322 = vmatpush3.msk.msra.mxu0 %vm65_vm0, %v32_v0  ;;  %1323 = vmatprep.mubr.msk.f32.mxu0 %vm40_vm1, %v24_v7  ;;  %vm1598_vm2 = vmmov 0   ;;  %v1599_v14 = vmov 0.0   ;;  %v1713_v18 = vld [vmem:[%s1868_s3] ss:$0 sm:$0xff] }
   0x8   :  { %1446 = vmatprep.subr.bf16.mxu1 %v1597_v8  ;;  %1324 = vmatmul.mubr.msk.f32.vlgmr.msra.gmra.mrb[0].mxu0 %vm40_vm1, %v25_v9  ;;  %s1600_s19 = smov 64   ;;  %s1601_s3 = smov 32   ;;  %vm187_vm3 = vcmask 261120   ;;  %v26_v54 = vld [vmem:[%s1865_s0 + $0x10] sm:$0xff]  ;;  %v27_v55 = vld [vmem:[%s1865_s0 + $0x18] sm:$0xff] }
   0x9   :  { %1333 = vmatmul.mubr.msk.f32.gmra.mrb[2].mxu1 %vm40_vm1, %v31_v12  ;;  %1455 = vmatprep.subr.bf16.mxu0 %v1597_v8 }
   0xa   :  { %1448 = vmatpush3.bf16.msra.mxu1 %v1683_v13  ;;  %1343 = vmatprep.mubr.msk.f32.mxu1 %vm1598_vm2, %v1599_v14 }
   0xb   :  { %1449 = vmatprep.subr.bf16.mxu1 %v1597_v8  ;;  %1457 = vmatpush3.bf16.msra.mxu0 %v1661_v6 }
   0xc   :  { %1458 = vmatprep.subr.bf16.mxu0 %v1597_v8  ;;  %1326 = vmatprep.mubr.msk.f32.mxu0 %vm40_vm1, %v26_v54 }
   0xd   :  { %1344 = vmatmul.mubr.f32.vlgmr.msra.gmra.mrb[4].mxu1 %v1599_v14  ;;  %1327 = vmatmul.mubr.msk.f32.gmra.mrb[2].mxu0 %vm40_vm1, %v27_v55 }
   0xe   :  { %1451 = vmatpush3.bf16.msra.mxu1 %v1661_v6  ;;  %1354 = vmatprep.mubr.msk.f32.mxu1 %vm1598_vm2, %v1599_v14 }
   0xf   :  { %1452 = vmatprep.subr.bf16.mxu1 %v1597_v8  ;;  %1460 = vmatpush3.bf16.msra.mxu0 %v1683_v13 }
  0x10   :  { %1467 = vmatprep.subr.bf16.mxu0 %v1597_v8  ;;  %1365 = vmatprep.mubr.msk.f32.mxu0 %vm1598_vm2, %v1599_v14 }
  0x12   :  { %1454 = vmatpush3.bf16.msra.mxu1 %v1683_v13 }
  0x13   :  { %1461 = vmatprep.subr.bf16.mxu1 %v1597_v8 }
  0xd7   :  { %v1706_v15 = vpop.f32.mrb[0].mxu1 }
  0xd8   :  { %v1708_v16 = vpop.f32.mrb[1].mxu1 }
  0xdb   :  { %v1325_v17 = vpop.f32.mrb[0].mxu0 }
  0xdc   :  { %v1715_v19 = vpop.f32.mrb[2].mxu1  ;;  %v135_v20 = vpop.f32.mrb[1].mxu0  ;;  %v141_v40 = vadd.f32 %v1325_v17, %v1713_v18 }
  0xdd   :  { %v1717_v21 = vpop.f32.mrb[3].mxu1  ;;  %v136_v22 = vadd.f32 %v1713_v18, %v135_v20 }
  0xe0   :  { %v257_v23 = vpop.f32.mrb[4].mxu1  ;;  %v1328_v59 = vpop.f32.mrb[2].mxu0 }
  0xe1   :  { %v261_v24 = vadd.f32 %v257_v23, %v136_v22  ;;  %v1345_v25 = vpop.f32.mrb[5].mxu1  ;;  %v145_v60 = vpop.f32.mrb[3].mxu0 }
  0xe2   :  { %v146_v62 = vadd.f32 %v1713_v18, %v145_v60  ;;  %v151_v25 = vadd.f32 %v1328_v59, %v1713_v18  ;;  %v161_v60 = vadd.f32 %v1706_v15, %v1713_v18 }
  0xe3   :  { %1509 = vtanh.f32 %v261_v24  ;;  %v1236_v27 = vmul.f32 -1.442695, %v261_v24 }
  0xe5   :  { %1511 = vpow2.f32 %v1236_v27 }
  0xed   :  { %v1510_v26 = vpop.eup %1509 }
  0xee   :  { %271 = vrot.lane.b32.xlu0 %v1510_v26, %s1600_s19 }
  0xef   :  { %v1512_v28 = vpop.eup %1511 }
  0xf0   :  { %v265_v29 = vadd.f32 1.0, %v1512_v28 }
  0xf2   :  { %1513 = vrcp.f32 %v265_v29 }
  0xfc   :  { %v1514_v30 = vpop.eup %1513 }
  0xfd   :  { %v269_v33 = vmul.f32 0.0, %v1514_v30 }
 0x160   :  { %v272_v31 = vpop.permute.xlu0 %271 }
 0x161   :  { %v274_v32 = vmul.f32 %v1514_v30, %v272_v31 }
 0x163   :  { %276 = vrot.lane.b32.xlu0 %v274_v32, %s1601_s3 }
 0x1d5   :  { %v277_v34 = vpop.permute.xlu0 %276 }
 0x1d6   :  { %v279_v35 = vadd.f32 %v277_v34, %v269_v33 }
 0x1d8   :  { %1515 = vtanh.f32 %v279_v35 }
 0x1e2   :  { %v1516_v36 = vpop.eup %1515 }
 0x1e3   :  { %282 = vrot.lane.b32.xlu1 %v1516_v36, %s1600_s19 }
 0x255   :  { %v283_v37 = vpop.permute.xlu1 %282 }
 0x256   :  { %v285_v38 = vmul.f32 %v1514_v30, %v283_v37 }
 0x258   :  { %287 = vrot.lane.b32.xlu1 %v285_v38, %s1601_s3 }
 0x2ca   :  { %v288_v39 = vpop.permute.xlu1 %287 }
 0x2cb   :  { %290 = vst.msk [vmem:[#allocation3] sm:$0xff] %vm187_vm3, %v288_v39  ;;  %1355 = vmatmul.mubr.msk.f32.vlgmr.msra.gmra.mrb[6].mxu1 %vm187_vm3, %v288_v39 }
 0x2cc   :  { %1463 = vmatpush3.bf16.msra.mxu1 %v1661_v6  ;;  %1376 = vmatprep.mubr.msk.f32.mxu1 %vm1598_vm2, %v1599_v14 }
 0x2cd   :  { %1464 = vmatprep.subr.bf16.mxu1 %v1597_v8 }
 0x2d0   :  { %1466 = vmatpush3.bf16.msra.mxu1 %v1683_v13 }
 0x2d1   :  { %1473 = vmatprep.subr.bf16.mxu1 %v1597_v8 }
 0x39e   :  { %v365_v41 = vpop.f32.mrb[6].mxu1 }
 0x39f   :  { %v369_v42 = vadd.f32 %v365_v41, %v141_v40  ;;  %v1356_v43 = vpop.f32.mrb[7].mxu1 }
 0x3a0   :  { %v156_v43 = vadd.f32 %v1713_v18, %v1708_v16 }
 0x3a1   :  { %1517 = vtanh.f32 %v369_v42  ;;  %v1238_v45 = vmul.f32 -1.442695, %v369_v42 }
 0x3a3   :  { %1519 = vpow2.f32 %v1238_v45 }
 0x3ab   :  { %v1518_v44 = vpop.eup %1517 }
 0x3ac   :  { %379 = vrot.lane.b32.xlu0 %v1518_v44, %s1600_s19 }
 0x3ad   :  { %v1520_v46 = vpop.eup %1519 }
 0x3ae   :  { %v373_v47 = vadd.f32 1.0, %v1520_v46 }
 0x3b0   :  { %1521 = vrcp.f32 %v373_v47 }
 0x3ba   :  { %v1522_v48 = vpop.eup %1521 }
 0x3bb   :  { %v377_v51 = vmul.f32 %v1522_v48, %v279_v35 }
 0x41e   :  { %v380_v49 = vpop.permute.xlu0 %379 }
 0x41f   :  { %v382_v50 = vmul.f32 %v1522_v48, %v380_v49 }
 0x421   :  { %384 = vrot.lane.b32.xlu1 %v382_v50, %s1601_s3 }
 0x493   :  { %v385_v52 = vpop.permute.xlu1 %384 }
 0x494   :  { %v387_v53 = vadd.f32 %v385_v52, %v377_v51 }
 0x496   :  { %1523 = vtanh.f32 %v387_v53 }
 0x4a0   :  { %v1524_v56 = vpop.eup %1523 }
 0x4a1   :  { %390 = vrot.lane.b32.xlu0 %v1524_v56, %s1600_s19 }
 0x513   :  { %v391_v57 = vpop.permute.xlu0 %390 }
 0x514   :  { %v393_v58 = vmul.f32 %v1522_v48, %v391_v57 }
 0x516   :  { %395 = vrot.lane.b32.xlu1 %v393_v58, %s1601_s3 }
 0x588   :  { %v396_v61 = vpop.permute.xlu1 %395 }
 0x589   :  { %399 = vst.msk [vmem:[#allocation3 + $0x8] sm:$0xff] %vm187_vm3, %v396_v61  ;;  %1366 = vmatmul.mubr.msk.f32.vlgmr.msra.gmra.mrb[4].mxu0 %vm187_vm3, %v396_v61 }
 0x58a   :  { %1469 = vmatpush3.bf16.msra.mxu0 %v1661_v6  ;;  %1387 = vmatprep.mubr.msk.f32.mxu0 %vm1598_vm2, %v1599_v14 }
 0x58b   :  { %1470 = vmatprep.subr.bf16.mxu0 %v1597_v8 }
 0x58e   :  { %1472 = vmatpush3.bf16.msra.mxu0 %v1683_v13 }
 0x58f   :  { %1479 = vmatprep.subr.bf16.mxu0 %v1597_v8 }
 0x65c   :  { %v474_v63 = vpop.f32.mrb[4].mxu0 }
 0x65d   :  { %v478_v0 = vadd.f32 %v474_v63, %v146_v62  ;;  %v1367_v1 = vpop.f32.mrb[5].mxu0 }
 0x65f   :  { %1525 = vtanh.f32 %v478_v0  ;;  %v1240_v3 = vmul.f32 -1.442695, %v478_v0 }
 0x661   :  { %1527 = vpow2.f32 %v1240_v3 }
 0x669   :  { %v1526_v2 = vpop.eup %1525 }
 0x66a   :  { %488 = vrot.lane.b32.xlu0 %v1526_v2, %s1600_s19 }
 0x66b   :  { %v1528_v4 = vpop.eup %1527 }
 0x66c   :  { %v482_v5 = vadd.f32 1.0, %v1528_v4 }
 0x66e   :  { %1529 = vrcp.f32 %v482_v5  ;;  %v1062_v5 = vld [vmem:[%s1869_s4] sm:$0xff] }
 0x678   :  { %v1530_v7 = vpop.eup %1529 }
 0x679   :  { %v486_v11 = vmul.f32 %v1530_v7, %v387_v53 }
 0x6dc   :  { %v489_v9 = vpop.permute.xlu0 %488 }
 0x6dd   :  { %v491_v10 = vmul.f32 %v1530_v7, %v489_v9 }
 0x6df   :  { %493 = vrot.lane.b32.xlu1 %v491_v10, %s1601_s3 }
 0x751   :  { %v494_v12 = vpop.permute.xlu1 %493 }
 0x752   :  { %v496_v17 = vadd.f32 %v494_v12, %v486_v11 }
 0x754   :  { %1531 = vtanh.f32 %v496_v17 }
 0x75e   :  { %v1532_v20 = vpop.eup %1531 }
 0x75f   :  { %499 = vrot.lane.b32.xlu0 %v1532_v20, %s1600_s19  ;;  %v1065_v20 = vld [vmem:[%s1869_s4 + $0x18] sm:$0xff] }
 0x7d1   :  { %v500_v22 = vpop.permute.xlu0 %499 }
 0x7d2   :  { %v502_v23 = vmul.f32 %v1530_v7, %v500_v22  ;;  %v1063_v7 = vld [vmem:[%s1869_s4 + $0x8] sm:$0xff] }
 0x7d3   :  { %v1491_v9 = vpack.c.bf16 %v1063_v7, %v1062_v5 }
 0x7d4   :  { %504 = vrot.lane.b32.xlu1 %v502_v23, %s1601_s3 }
 0x846   :  { %v505_v24 = vpop.permute.xlu1 %504 }
 0x847   :  { %508 = vst.msk [vmem:[#allocation3 + $0x10] sm:$0xff] %vm187_vm3, %v505_v24  ;;  %1377 = vmatmul.mubr.msk.f32.vlgmr.msra.gmra.mrb[8].mxu1 %vm187_vm3, %v505_v24  ;;  %v1054_v24 = vld [vmem:[#allocation3] sm:$0xff] }
 0x848   :  { %1475 = vmatpush3.bf16.msra.mxu1 %v1661_v6  ;;  %1398 = vmatprep.mubr.msk.f32.mxu1 %vm1598_vm2, %v1599_v14 }
 0x849   :  { %1476 = vmatprep.subr.bf16.mxu1 %v1597_v8 }
 0x84c   :  { %1478 = vmatpush3.bf16.msra.mxu1 %v1683_v13 }
 0x84d   :  { %1485 = vmatprep.subr.bf16.mxu1 %v1597_v8 }
 0x91a   :  { %v583_v26 = vpop.f32.mrb[8].mxu1 }
 0x91b   :  { %v587_v27 = vadd.f32 %v583_v26, %v151_v25  ;;  %v1378_v28 = vpop.f32.mrb[9].mxu1  ;;  %v1055_v25 = vld [vmem:[#allocation3 + $0x8] sm:$0xff]  ;;  %v1056_v26 = vld [vmem:[#allocation3 + $0x10] sm:$0xff] }
 0x91d   :  { %1533 = vtanh.f32 %v587_v27  ;;  %v1242_v30 = vmul.f32 -1.442695, %v587_v27 }
 0x91f   :  { %1535 = vpow2.f32 %v1242_v30  ;;  %v166_v30 = vadd.f32 %v1713_v18, %v1717_v21 }
 0x927   :  { %v1534_v29 = vpop.eup %1533 }
 0x928   :  { %597 = vrot.lane.b32.xlu0 %v1534_v29, %s1600_s19 }
 0x929   :  { %v1536_v31 = vpop.eup %1535 }
 0x92a   :  { %v591_v32 = vadd.f32 1.0, %v1536_v31 }
 0x92c   :  { %1537 = vrcp.f32 %v591_v32 }
 0x936   :  { %v1538_v33 = vpop.eup %1537 }
 0x937   :  { %v595_v36 = vmul.f32 %v1538_v33, %v496_v17  ;;  %v1064_v17 = vld [vmem:[%s1869_s4 + $0x10] sm:$0xff] }
 0x938   :  { %v1495_v22 = vpack.c.bf16 %v1065_v20, %v1064_v17 }
 0x99a   :  { %v598_v34 = vpop.permute.xlu0 %597 }
 0x99b   :  { %v600_v35 = vmul.f32 %v1538_v33, %v598_v34  ;;  %v1827_v34 = vld [vmem:[%s1870_s5] ss:$0 sm:$0xff]  ;;  %s1602_s5 = smov [#allocation4]  }
 0x99c   :  { %s1215_s7 = sshll.u32 %s1602_s5, 4  ;;  %s1216_s7 = int_to_ptr.vmem [resolvable:$true] %s1215_s7 }
 0x99d   :  { %602 = vrot.lane.b32.xlu1 %v600_v35, %s1601_s3  ;;  %s1573_s8 = scalar_lea.vmem %s1216_s7, 1024  ;;  %p1578_p1 = scmp.lt.s32.totalorder %s1216_s7, %s1216_s7 }
 0x99e   :  { %p1574_p0 = scmp.ne.s32.totalorder %s1216_s7, %s1573_s8  ;;  %p1579_p2 = scmp.lt.s32.totalorder %s1573_s8, %s1573_s8 }
 0x9a0   :  { %p1580_p3 = por %p1579_p2, %p1578_p1 }
 0x9a2   :  { %p1581_p4 = pnand %p1580_p3, %p1574_p0 }
 0xa0f   :  { %v603_v37 = vpop.permute.xlu1 %602 }
 0xa10   :  { %v605_v38 = vadd.f32 %v603_v37, %v595_v36 }
 0xa12   :  { %1539 = vtanh.f32 %v605_v38 }
 0xa1c   :  { %v1540_v39 = vpop.eup %1539 }
 0xa1d   :  { %608 = vrot.lane.b32.xlu0 %v1540_v39, %s1600_s19 }
 0xa8f   :  { %v609_v40 = vpop.permute.xlu0 %608 }
 0xa90   :  { %v611_v41 = vmul.f32 %v1538_v33, %v609_v40 }
 0xa92   :  { %613 = vrot.lane.b32.xlu1 %v611_v41, %s1601_s3 }
 0xb04   :  { %v614_v42 = vpop.permute.xlu1 %613 }
 0xb05   :  { %617 = vst.msk [vmem:[#allocation3 + $0x18] sm:$0xff] %vm187_vm3, %v614_v42  ;;  %1388 = vmatmul.mubr.msk.f32.vlgmr.msra.gmra.mrb[6].mxu0 %vm187_vm3, %v614_v42 }
 0xb06   :  { %1481 = vmatpush3.bf16.msra.mxu0 %v1661_v6  ;;  %1409 = vmatprep.mubr.msk.f32.mxu0 %vm1598_vm2, %v1599_v14 }
 0xb07   :  { %1482 = vmatprep.subr.bf16.mxu0 %v1597_v8 }
 0xb0a   :  { %1484 = vmatpush3.bf16.msra.mxu0 %v1683_v13 }
 0xb0b   :  { %1492 = vmatprep.subr.bf16.mxu0 %v1491_v9 }
 0xb0c   :  { %v1057_v27 = vld [vmem:[#allocation3 + $0x18] sm:$0xff] }
 0xbd8   :  { %v692_v44 = vpop.f32.mrb[6].mxu0 }
 0xbd9   :  { %v696_v45 = vadd.f32 %v692_v44, %v156_v43  ;;  %v1389_v46 = vpop.f32.mrb[7].mxu0 }
 0xbdb   :  { %1541 = vtanh.f32 %v696_v45  ;;  %v1244_v48 = vmul.f32 -1.442695, %v696_v45 }
 0xbdd   :  { %1543 = vpow2.f32 %v1244_v48 }
 0xbe5   :  { %v1542_v47 = vpop.eup %1541 }
 0xbe6   :  { %706 = vrot.lane.b32.xlu0 %v1542_v47, %s1600_s19 }
 0xbe7   :  { %v1544_v49 = vpop.eup %1543 }
 0xbe8   :  { %v700_v50 = vadd.f32 1.0, %v1544_v49 }
 0xbea   :  { %1545 = vrcp.f32 %v700_v50 }
 0xbf4   :  { %v1546_v51 = vpop.eup %1545 }
 0xbf5   :  { %v704_v54 = vmul.f32 %v1546_v51, %v605_v38 }
 0xc58   :  { %v707_v52 = vpop.permute.xlu0 %706 }
 0xc59   :  { %v709_v53 = vmul.f32 %v1546_v51, %v707_v52 }
 0xc5b   :  { %711 = vrot.lane.b32.xlu1 %v709_v53, %s1601_s3 }
 0xccd   :  { %v712_v55 = vpop.permute.xlu1 %711 }
 0xcce   :  { %v714_v16 = vadd.f32 %v712_v55, %v704_v54 }
 0xcd0   :  { %1547 = vtanh.f32 %v714_v16 }
 0xcda   :  { %v1548_v56 = vpop.eup %1547 }
 0xcdb   :  { %717 = vrot.lane.b32.xlu0 %v1548_v56, %s1600_s19 }
 0xd4d   :  { %v718_v57 = vpop.permute.xlu0 %717 }
 0xd4e   :  { %v720_v58 = vmul.f32 %v1546_v51, %v718_v57 }
 0xd50   :  { %722 = vrot.lane.b32.xlu1 %v720_v58, %s1601_s3 }
 0xdc2   :  { %v723_v59 = vpop.permute.xlu1 %722 }
 0xdc3   :  { %726 = vst.msk [vmem:[#allocation3 + $0x20] sm:$0xff] %vm187_vm3, %v723_v59  ;;  %1399 = vmatmul.mubr.msk.f32.vlgmr.msra.gmra.mrb[10].mxu1 %vm187_vm3, %v723_v59 }
 0xdc4   :  { %1487 = vmatpush3.bf16.msra.mxu1 %v1661_v6  ;;  %1420 = vmatprep.mubr.msk.f32.mxu1 %vm1598_vm2, %v1599_v14 }
 0xdc5   :  { %1488 = vmatprep.subr.bf16.mxu1 %v1597_v8 }
 0xdc8   :  { %1490 = vmatpush3.bf16.msra.mxu1 %v1683_v13 }
 0xdca   :  { %v1058_v28 = vld [vmem:[#allocation3 + $0x20] sm:$0xff] }
 0xe96   :  { %v801_v61 = vpop.f32.mrb[10].mxu1 }
 0xe97   :  { %v805_v62 = vadd.f32 %v801_v61, %v161_v60  ;;  %v1400_v63 = vpop.f32.mrb[11].mxu1  ;;  %v171_v60 = vadd.f32 %v1715_v19, %v1713_v18 }
 0xe99   :  { %1549 = vtanh.f32 %v805_v62  ;;  %v1246_v1 = vmul.f32 -1.442695, %v805_v62 }
 0xe9b   :  { %1551 = vpow2.f32 %v1246_v1 }
 0xea3   :  { %v1550_v0 = vpop.eup %1549 }
 0xea4   :  { %815 = vrot.lane.b32.xlu0 %v1550_v0, %s1600_s19 }
 0xea5   :  { %v1552_v6 = vpop.eup %1551 }
 0xea6   :  { %v809_v2 = vadd.f32 1.0, %v1552_v6 }
 0xea8   :  { %1553 = vrcp.f32 %v809_v2 }
 0xeb2   :  { %v1554_v14 = vpop.eup %1553 }
 0xeb3   :  { %v813_v13 = vmul.f32 %v1554_v14, %v714_v16 }
 0xf16   :  { %v816_v3 = vpop.permute.xlu0 %815 }
 0xf17   :  { %v818_v8 = vmul.f32 %v1554_v14, %v816_v3 }
 0xf19   :  { %820 = vrot.lane.b32.xlu1 %v818_v8, %s1601_s3 }
 0xf8b   :  { %v821_v4 = vpop.permute.xlu1 %820 }
 0xf8c   :  { %v1797_v15 = vadd.f32 %v821_v4, %v813_v13 }
 0xf8e   :  { %1555 = vtanh.f32 %v1797_v15 }
 0xf98   :  { %v1556_v10 = vpop.eup %1555 }
 0xf99   :  { %826 = vrot.lane.b32.xlu0 %v1556_v10, %s1600_s19 }
0x100b   :  { %v827_v11 = vpop.permute.xlu0 %826 }
0x100c   :  { %v829_v12 = vmul.f32 %v1554_v14, %v827_v11 }
0x100e   :  { %831 = vrot.lane.b32.xlu1 %v829_v12, %s1601_s3 }
0x1080   :  { %v832_v23 = vpop.permute.xlu1 %831 }
0x1081   :  { %835 = vst.msk [vmem:[#allocation3 + $0x28] sm:$0xff] %vm187_vm3, %v832_v23  ;;  %1410 = vmatmul.mubr.msk.f32.vlgmr.msra.gmra.mrb[8].mxu0 %vm187_vm3, %v832_v23 }
0x1082   :  { %1494 = vmatpush3.bf16.msra.mxu0 %v1491_v9  ;;  %1431 = vmatprep.mubr.msk.f32.mxu0 %vm187_vm3, %v1054_v24 }
0x1083   :  { %1496 = vmatprep.subr.bf16.mxu0 %v1495_v22 }
0x1086   :  { %1498 = vmatpush3.bf16.msra.mxu0 %v1495_v22 }
0x1088   :  { %v1059_v29 = vld [vmem:[#allocation3 + $0x28] sm:$0xff] }
0x1089   :  { %1432 = vmatmul.mubr.msk.f32.vlgmr.msra.gmra.mrb[10].mxu0 %vm187_vm3, %v1055_v25 }
0x108a   :  { %1434 = vmatprep.mubr.msk.f32.mxu0 %vm187_vm3, %v1056_v26 }
0x108d   :  { %1435 = vmatmul.mubr.msk.f32.gmra.mrb[12].mxu0 %vm187_vm3, %v1057_v27 }
0x108e   :  { %1437 = vmatprep.mubr.msk.f32.mxu0 %vm187_vm3, %v1058_v28 }
0x1091   :  { %1438 = vmatmul.mubr.msk.f32.gmra.mrb[14].mxu0 %vm187_vm3, %v1059_v29 }
0x1154   :  { %v910_v31 = vpop.f32.mrb[8].mxu0 }
0x1155   :  { %v914_v32 = vadd.f32 %v910_v31, %v166_v30  ;;  %v1411_v33 = vpop.f32.mrb[9].mxu0 }
0x1157   :  { %1557 = vtanh.f32 %v914_v32  ;;  %v1248_v47 = vmul.f32 -1.442695, %v914_v32 }
0x1159   :  { %1559 = vpow2.f32 %v1248_v47 }
0x115c   :  { %v1433_v35 = vpop.f32.mrb[10].mxu0 }
0x115d   :  { %v1169_v36 = vadd.f32 %v1433_v35, %v1827_v34  ;;  %v1163_v37 = vpop.f32.mrb[11].mxu0 }
0x115e   :  { %v1164_v38 = vadd.f32 %v1827_v34, %v1163_v37 }
0x115f   :  { %1203 = vst [vmem:[#allocation4 + $0x8] sm:$0xff] %v1169_v36 }
0x1160   :  { %1202 = vst [vmem:[#allocation4] sm:$0xff] %v1164_v38  ;;  %v1436_v39 = vpop.f32.mrb[12].mxu0 }
0x1161   :  { %v1558_v40 = vpop.eup %1557  ;;  %v1179_v21 = vadd.f32 %v1436_v39, %v1827_v34  ;;  %v1173_v41 = vpop.f32.mrb[13].mxu0 }
0x1162   :  { %v1174_v42 = vadd.f32 %v1827_v34, %v1173_v41  ;;  %924 = vrot.lane.b32.xlu0 %v1558_v40, %s1600_s19 }
0x1163   :  { %1205 = vst [vmem:[#allocation4 + $0x18] sm:$0xff] %v1179_v21  ;;  %v1560_v48 = vpop.eup %1559 }
0x1164   :  { %1204 = vst [vmem:[#allocation4 + $0x10] sm:$0xff] %v1174_v42  ;;  %v1439_v43 = vpop.f32.mrb[14].mxu0  ;;  %v918_v49 = vadd.f32 1.0, %v1560_v48 }
0x1165   :  { %v1189_v44 = vadd.f32 %v1439_v43, %v1827_v34  ;;  %v1183_v45 = vpop.f32.mrb[15].mxu0 }
0x1166   :  { %v1184_v46 = vadd.f32 %v1827_v34, %v1183_v45  ;;  %1561 = vrcp.f32 %v918_v49 }
0x1167   :  { %1207 = vst [vmem:[#allocation4 + $0x28] sm:$0xff] %v1189_v44 }
0x1168   :  { %1206 = vst [vmem:[#allocation4 + $0x20] sm:$0xff] %v1184_v46 }
0x1170   :  { %v1562_v50 = vpop.eup %1561 }
0x1171   :  { %v922_v53 = vmul.f32 %v1562_v50, %v1797_v15 }
0x11d4   :  { %v925_v51 = vpop.permute.xlu0 %924 }
0x11d5   :  { %v927_v52 = vmul.f32 %v1562_v50, %v925_v51 }
0x11d7   :  { %929 = vrot.lane.b32.xlu1 %v927_v52, %s1601_s3 }
0x1249   :  { %v930_v54 = vpop.permute.xlu1 %929 }
0x124a   :  { %v932_v55 = vadd.f32 %v930_v54, %v922_v53 }
0x124c   :  { %1563 = vtanh.f32 %v932_v55 }
0x1256   :  { %v1564_v16 = vpop.eup %1563 }
0x1257   :  { %935 = vrot.lane.b32.xlu0 %v1564_v16, %s1600_s19 }
0x12c9   :  { %v936_v56 = vpop.permute.xlu0 %935 }
0x12ca   :  { %v938_v57 = vmul.f32 %v1562_v50, %v936_v56 }
0x12cc   :  { %940 = vrot.lane.b32.xlu1 %v938_v57, %s1601_s3 }
0x133e   :  { %v941_v58 = vpop.permute.xlu1 %940 }
0x133f   :  { %944 = vst.msk [vmem:[#allocation3 + $0x30] sm:$0xff] %vm187_vm3, %v941_v58  ;;  %1421 = vmatmul.mubr.msk.f32.vlgmr.msra.gmra.mrb[12].mxu1 %vm187_vm3, %v941_v58 }
0x1346   :  { %v1060_v59 = vld [vmem:[#allocation3 + $0x30] sm:$0xff] }
0x1347   :  { %1440 = vmatprep.mubr.msk.f32.mxu0 %vm187_vm3, %v1060_v59 }
0x1412   :  { %v1019_v61 = vpop.f32.mrb[12].mxu1 }
0x1413   :  { %v1023_v62 = vadd.f32 %v1019_v61, %v171_v60  ;;  %v1422_v63 = vpop.f32.mrb[13].mxu1 }
0x1415   :  { %1565 = vtanh.f32 %v1023_v62  ;;  %v1250_v1 = vmul.f32 -1.442695, %v1023_v62 }
0x1417   :  { %1567 = vpow2.f32 %v1250_v1 }
0x141f   :  { %v1566_v0 = vpop.eup %1565 }
0x1420   :  { %1033 = vrot.lane.b32.xlu0 %v1566_v0, %s1600_s19 }
0x1421   :  { %v1568_v6 = vpop.eup %1567 }
0x1422   :  { %v1027_v2 = vadd.f32 1.0, %v1568_v6 }
0x1424   :  { %1569 = vrcp.f32 %v1027_v2 }
0x142e   :  { %v1570_v14 = vpop.eup %1569 }
0x142f   :  { %v1031_v13 = vmul.f32 %v1570_v14, %v932_v55 }
0x1492   :  { %v1034_v3 = vpop.permute.xlu0 %1033 }
0x1493   :  { %v1036_v8 = vmul.f32 %v1570_v14, %v1034_v3 }
0x1495   :  { %1038 = vrot.lane.b32.xlu1 %v1036_v8, %s1601_s3 }
0x1507   :  { %v1039_v4 = vpop.permute.xlu1 %1038 }
0x1508   :  { %v1041_v18 = vadd.f32 %v1039_v4, %v1031_v13 }
0x150a   :  { %1571 = vtanh.f32 %v1041_v18 }
0x1514   :  { %v1572_v19 = vpop.eup %1571 }
0x1515   :  { %1044 = vrot.lane.b32.xlu0 %v1572_v19, %s1600_s19 }
0x1587   :  { %v1045_v15 = vpop.permute.xlu0 %1044 }
0x1588   :  { %v1047_v5 = vmul.f32 %v1570_v14, %v1045_v15 }
0x158a   :  { %1049 = vrot.lane.b32.xlu1 %v1047_v5, %s1601_s3 }
0x15fc   :  { %v1050_v7 = vpop.permute.xlu1 %1049 }
0x15fd   :  { %1053 = vst.msk [vmem:[#allocation3 + $0x38] sm:$0xff] %vm187_vm3, %v1050_v7 }
0x1604   :  { %v1061_v9 = vld [vmem:[#allocation3 + $0x38] sm:$0xff] }
0x1605   :  { %1441 = vmatmul.mubr.msk.f32.gmra.mrb[16].mxu0 %vm187_vm3, %v1061_v9 }
0x16d8   :  { %v1442_v10 = vpop.f32.mrb[16].mxu0 }
0x16d9   :  { %v1199_v11 = vadd.f32 %v1442_v10, %v1827_v34  ;;  %v1193_v12 = vpop.f32.mrb[17].mxu0 }
0x16da   :  { %v1194_v17 = vadd.f32 %v1827_v34, %v1193_v12 }
0x16db   :  { %1209 = vst [vmem:[#allocation4 + $0x38] sm:$0xff] %v1199_v11 }
0x16dc   :  { %1208 = vst [vmem:[#allocation4 + $0x30] sm:$0xff] %v1194_v17 }
0x16dd   :  { %1584 = shalt.err (!%p1581_p4)
}
0x16de   :  { %s1585_s11 = scalar_lea.hbm %s1871_s6, 1024 }
0x16df   :  { %p1586_p5 = scmp.ne.s32.totalorder %s1871_s6, %s1585_s11  ;;  %p1589_p6 = scmp.lt.u32.totalorder %s1585_s11, %s1871_s6 }
0x16e1   :  { %p1591_p7 = pnand %p1589_p6, %p1586_p5 }
0x16e3   :  { %1594 = shalt.err (!%p1591_p7)
}
0x16e4   :  { %s1603_s16 = smov 128   ;;  %s1604_s17 = smov 8  }
0x16e5   :  { %1221 = dma.vmem_to_hbm [thread:$0]  %s1216_s7, 1024, %s1871_s6, [#allocation5], %s1603_s16, %s1603_s16, %s1604_s17  }
0x16e6   :  { %1595 = dma.done.wait [#allocation5], 1024  }
0x16e7   :  { %1596 = vsyncadd [#allocation5], 4294966272 }
0x16e8   :  { %1225 = vsyncpa [#allocation5], 1 }

</bundles_post_ra>
